<compile_context>
chip_gen: v5e
topology: v5e:2x2
jax: 0.10.0
libtpu: 0.0.40
codegen_flags: <defaults>
</compile_context>

<pallas_src>
import functools

import numpy as np
import jax
import jax.numpy as jnp
from jax.experimental import pallas as pl
from jax.experimental.pallas import tpu as pltpu


def _gaussian_1d(window_size, sigma):
    """Matches torch `gaussian(window_size, sigma)` (normalized 1D Gaussian)."""
    g = np.array(
        [np.exp(-((i - window_size // 2) ** 2) / float(2 * sigma ** 2))
         for i in range(window_size)], dtype=np.float64)
    return (g / g.sum()).astype(np.float32)


def _banded_gaussian_matrix(n, gauss):
    """(n, n) banded matrix M with M[k, c] = gauss[c - k + pad] inside the band.

    `M @ img` (or `img @ M`) is exactly the 1-D zero-padded 'same' Gaussian
    filter along that axis, i.e. F.conv2d(..., padding=window_size // 2).
    The construction is exact for any n (if n < window_size the band simply
    covers the whole matrix, matching conv2d's zero padding).
    """
    ws = gauss.shape[0]
    pad = ws // 2
    idx = np.arange(n)
    diff = idx[None, :] - idx[:, None]          # diff[k, c] = c - k
    mat = np.where(np.abs(diff) <= pad,
                   gauss[np.clip(diff + pad, 0, ws - 1)],
                   0.0)
    return mat.astype(np.float32)


def _block_diag(mat, k):
    """k copies of `mat` on the diagonal (keeps lane-packed planes independent)."""
    n = mat.shape[0]
    out = np.zeros((k * n, k * n), dtype=np.float32)
    for j in range(k):
        out[j * n:(j + 1) * n, j * n:(j + 1) * n] = mat
    return out


def _ssim_kernel(x_ref, y_ref, gw_ref, gh_ref, out_ref, s_ref, t_ref, *, P, H, KW):
    f32 = jnp.float32
    PH = P * H

    x = x_ref[...].astype(f32).reshape(PH, KW)
    y = y_ref[...].astype(f32).reshape(PH, KW)

    # Stack the five conv operands (rows ordered (operand, plane, image-row))
    # directly into VMEM scratch — no jnp.concatenate copy.
    s_ref[0 * PH:1 * PH, :] = x
    s_ref[1 * PH:2 * PH, :] = y
    s_ref[2 * PH:3 * PH, :] = x * x
    s_ref[3 * PH:4 * PH, :] = y * y
    s_ref[4 * PH:5 * PH, :] = x * y

    # Horizontal zero-padded 'same' blur: ONE (5PH, KW) @ (KW, KW) MXU matmul.
    # NOTE: f32 matmul kept for exact parity with the reference; casting both
    # operands to bf16 here (keeping f32 accumulation) is the v6e/v7x speedup
    # if tolerance allows.
    hor = jnp.dot(s_ref[...], gw_ref[...], preferred_element_type=f32)

    # Relayout (5P planes of (H, KW)) -> (H, 5P*KW) with plain aligned copies
    # so the vertical blur is ONE shared (H, H) @ (H, 5P*KW) matmul
    # (no broadcast of Gh, no 5P tiny batched matmuls).
    for n in range(5 * P):
        t_ref[:, n * KW:(n + 1) * KW] = hor[n * H:(n + 1) * H, :]

    vert = jnp.dot(gh_ref[...], t_ref[...], preferred_element_type=f32)  # (H, 5P*KW)

    PK = P * KW
    mu1 = vert[:, 0 * PK:1 * PK]
    mu2 = vert[:, 1 * PK:2 * PK]
    ex2 = vert[:, 2 * PK:3 * PK]
    ey2 = vert[:, 3 * PK:4 * PK]
    exy = vert[:, 4 * PK:5 * PK]

    mu1_sq = mu1 * mu1
    mu2_sq = mu2 * mu2
    mu1_mu2 = mu1 * mu2
    sigma1_sq = ex2 - mu1_sq
    sigma2_sq = ey2 - mu2_sq
    sigma12 = exy - mu1_mu2

    C1 = 0.01 ** 2
    C2 = 0.03 ** 2
    num = (2.0 * mu1_mu2 + C1) * (2.0 * sigma12 + C2)
    den = (mu1_sq + mu2_sq + C1) * (sigma1_sq + sigma2_sq + C2)
    # Exact division (pl.reciprocal(approx=True)'s ~1e-3 error is too coarse).
    ssim_map = num / den

    # Per-block partial sum into a lane-dense (1, 1, 128) tile.
    out_ref[...] = jnp.broadcast_to(jnp.sum(ssim_map), out_ref.shape)


def _vmem_limits():
    """(vmem_limit_bytes, planning budget) sized for the current TPU generation."""
    try:
        cap = int(pltpu.get_tpu_info().vmem_capacity_bytes)
    except Exception:
        cap = 64 * 1024 * 1024                  # conservative (v7x-sized)
    if cap <= 80 * 1024 * 1024:                  # v7x: 64 MiB / TensorCore
        limit = int(cap * 0.6)
    else:                                        # v5e / v6e: 128 MiB
        limit = int(cap * 0.75)
    return limit, int(limit * 0.6)


def _lane_pack_factor(bc, w, lanes=128):
    """Largest divisor k of bc with k*w <= 128 (fills vreg lanes for small W)."""
    if w >= lanes:
        return 1
    best = 1
    for k in range(1, min(bc, lanes // w) + 1):
        if bc % k == 0:
            best = k
    return best


def _choose_planes(g, h, kw, in_bytes, budget, max_p=32):
    """Packed-plane-groups per grid step fitting the VMEM planning budget."""
    # ~f32 footprint per group: 2 scratches + 2 matmul results + ~8 SSIM-tail
    # temporaries + double-buffered input blocks.
    per_p = (120 + 4 * in_bytes) * h * kw
    fixed = 8 * (kw * kw + h * h) + (1 << 16)
    feas = [d for d in range(1, min(g, max_p) + 1)
            if g % d == 0 and fixed + d * per_p <= budget]
    if not feas:
        return 1
    best = max(feas)
    # Prefer an even number of grid steps so the "parallel" axis shards across
    # both TensorCores on multi-TC chips (v7x), if it costs at most 2x in P.
    even = [d for d in feas if (g // d) % 2 == 0]
    if even and 2 * max(even) >= best:
        best = max(even)
    return best


def ssim_loss(img1, img2, window_size=11, size_average=True):
    """Computes 1 - SSIM(img1, img2), img1/img2 in NCHW."""
    # TODO(synk): size_average=False (returning the full SSIM map) not implemented.
    assert size_average, "only size_average=True is supported"
    assert window_size % 2 == 1, "window_size must be odd (torch 'same' padding)"
    assert img1.shape == img2.shape
    B, C, H, W = img1.shape
    BC = B * C

    # Lane-pack k planes along the last axis so vregs / MXU columns are dense
    # even for small images.  Inputs keep their HBM dtype; cast to f32 in-kernel.
    k = _lane_pack_factor(BC, W)
    G, KW = BC // k, k * W

    def _pack(a):
        a = a.reshape(BC, H, W)
        if k == 1:
            return a
        a = a.reshape(G, k, H, W)
        a = jnp.transpose(a, (0, 2, 1, 3))
        return a.reshape(G, H, KW)

    x = _pack(img1)
    y = _pack(img2)

    gauss = _gaussian_1d(window_size, 1.5)
    gw = jnp.asarray(_block_diag(_banded_gaussian_matrix(W, gauss), k))   # (KW, KW)
    gh = jnp.asarray(_banded_gaussian_matrix(H, gauss))                   # (H, H)
    # TODO(synk): for very large W/H (>= ~512) use block-banded tiling of gw/gh
    # (and spatial tiling of the image) instead of the dense banded matmuls.

    limit, budget = _vmem_limits()
    P = _choose_planes(G, H, KW, jnp.dtype(img1.dtype).itemsize, budget)
    nb = G // P
    kern = functools.partial(_ssim_kernel, P=P, H=H, KW=KW)

    acc = pl.pallas_call(
        kern,
        out_shape=jax.ShapeDtypeStruct((nb, 1, 128), jnp.float32),
        grid_spec=pltpu.PrefetchScalarGridSpec(
            num_scalar_prefetch=0,
            grid=(nb,),
            in_specs=[
                pl.BlockSpec((P, H, KW), lambda i: (i, 0, 0)),
                pl.BlockSpec((P, H, KW), lambda i: (i, 0, 0)),
                pl.BlockSpec((KW, KW), lambda i: (0, 0)),
                pl.BlockSpec((H, H), lambda i: (0, 0)),
            ],
            out_specs=pl.BlockSpec((1, 1, 128), lambda i: (i, 0, 0)),
            scratch_shapes=[
                pltpu.VMEM((5 * P * H, KW), jnp.float32),   # stacked operands
                pltpu.VMEM((H, 5 * P * KW), jnp.float32),   # vertical-pass layout
            ],
        ),
        compiler_params=pltpu.CompilerParams(
            dimension_semantics=("parallel",),
            vmem_limit_bytes=limit),
    )(x, y, gw, gh)

    mean_ssim = jnp.sum(acc[:, 0, 0]) / jnp.float32(BC * H * W)
    return (1.0 - mean_ssim).astype(jnp.float32)


if __name__ == "__main__":
    key = jax.random.PRNGKey(0)
    k1, k2 = jax.random.split(key)
    B, C, H, W = 2, 4, 16, 16
    img1 = jax.random.uniform(k1, (B, C, H, W), dtype=jnp.float32)
    img2 = jax.random.uniform(k2, (B, C, H, W), dtype=jnp.float32)

    loss = jax.jit(ssim_loss)(img1, img2)
    jax.block_until_ready(loss)

    # sanity: SSIM of an image with itself is 1 -> loss ~ 0
    self_loss = jax.jit(ssim_loss)(img1, img1)
    jax.block_until_ready(self_loss)
    assert abs(float(self_loss)) < 1e-4, float(self_loss)
    assert 0.0 <= float(loss) <= 2.0, float(loss)

    print("KERNEL_OK")
</pallas_src>

<mosaic_0001>
module attributes {stable_mosaic.version = 11 : i64} {
  func.func @_ssim_kernel(%arg0: i32, %arg1: memref<1x16x128xf32, #tpu.memory_space<vmem>>, %arg2: memref<1x16x128xf32, #tpu.memory_space<vmem>>, %arg3: memref<128x128xf32, #tpu.memory_space<vmem>>, %arg4: memref<16x16xf32, #tpu.memory_space<vmem>>, %arg5: memref<1x1x128xf32, #tpu.memory_space<vmem>>, %arg6: memref<80x128xf32, #tpu.memory_space<vmem>>, %arg7: memref<16x640xf32, #tpu.memory_space<vmem>>) attributes {dimension_semantics = [#tpu.dimension_semantics<parallel>], iteration_bounds = array<i64: 1>, scalar_prefetch = 0 : i64, scratch_operands = 2 : i64, tpu.core_type = #tpu.core_type<tc>, window_params = [{transform_indices = @transform_0, window_bounds = array<i64: 1, 16, 128>}, {transform_indices = @transform_1, window_bounds = array<i64: 1, 16, 128>}, {pipeline_mode = #tpu.pipeline_mode<synchronous>, transform_indices = @transform_2, window_bounds = array<i64: 128, 128>}, {pipeline_mode = #tpu.pipeline_mode<synchronous>, transform_indices = @transform_3, window_bounds = array<i64: 16, 16>}, {transform_indices = @transform_4, window_bounds = array<i64: 1, 1, 128>}]} {
    %c0 = arith.constant 0 : index
    %c0_0 = arith.constant 0 : index
    %c0_1 = arith.constant 0 : index
    %0 = vector.load %arg1[%c0, %c0_0, %c0_1] : memref<1x16x128xf32, #tpu.memory_space<vmem>>, vector<1x16x128xf32>
    %1 = vector.shape_cast %0 : vector<1x16x128xf32> to vector<16x128xf32>
    %c0_2 = arith.constant 0 : index
    %c0_3 = arith.constant 0 : index
    %c0_4 = arith.constant 0 : index
    %2 = vector.load %arg2[%c0_2, %c0_3, %c0_4] : memref<1x16x128xf32, #tpu.memory_space<vmem>>, vector<1x16x128xf32>
    %3 = vector.shape_cast %2 : vector<1x16x128xf32> to vector<16x128xf32>
    %c0_5 = arith.constant 0 : index
    %c0_6 = arith.constant 0 : index
    %4 = vector.load %arg6[%c0_5, %c0_6] : memref<80x128xf32, #tpu.memory_space<vmem>>, vector<16x128xf32>
    tpu.vector_store %arg6[%c0_5, %c0_6], %1 {strides = array<i32>} : memref<80x128xf32, #tpu.memory_space<vmem>>, vector<16x128xf32>,
    %c16 = arith.constant 16 : index
    %c0_7 = arith.constant 0 : index
    %5 = vector.load %arg6[%c16, %c0_7] : memref<80x128xf32, #tpu.memory_space<vmem>>, vector<16x128xf32>
    tpu.vector_store %arg6[%c16, %c0_7], %3 {strides = array<i32>} : memref<80x128xf32, #tpu.memory_space<vmem>>, vector<16x128xf32>,
    %6 = arith.mulf %1, %1 : vector<16x128xf32>
    %c32 = arith.constant 32 : index
    %c0_8 = arith.constant 0 : index
    %7 = vector.load %arg6[%c32, %c0_8] : memref<80x128xf32, #tpu.memory_space<vmem>>, vector<16x128xf32>
    tpu.vector_store %arg6[%c32, %c0_8], %6 {strides = array<i32>} : memref<80x128xf32, #tpu.memory_space<vmem>>, vector<16x128xf32>,
    %8 = arith.mulf %3, %3 : vector<16x128xf32>
    %c48 = arith.constant 48 : index
    %c0_9 = arith.constant 0 : index
    %9 = vector.load %arg6[%c48, %c0_9] : memref<80x128xf32, #tpu.memory_space<vmem>>, vector<16x128xf32>
    tpu.vector_store %arg6[%c48, %c0_9], %8 {strides = array<i32>} : memref<80x128xf32, #tpu.memory_space<vmem>>, vector<16x128xf32>,
    %10 = arith.mulf %1, %3 : vector<16x128xf32>
    %c64 = arith.constant 64 : index
    %c0_10 = arith.constant 0 : index
    %11 = vector.load %arg6[%c64, %c0_10] : memref<80x128xf32, #tpu.memory_space<vmem>>, vector<16x128xf32>
    tpu.vector_store %arg6[%c64, %c0_10], %10 {strides = array<i32>} : memref<80x128xf32, #tpu.memory_space<vmem>>, vector<16x128xf32>,
    %c0_11 = arith.constant 0 : index
    %c0_12 = arith.constant 0 : index
    %12 = vector.load %arg6[%c0_11, %c0_12] : memref<80x128xf32, #tpu.memory_space<vmem>>, vector<80x128xf32>
    %c0_13 = arith.constant 0 : index
    %c0_14 = arith.constant 0 : index
    %13 = vector.load %arg3[%c0_13, %c0_14] : memref<128x128xf32, #tpu.memory_space<vmem>>, vector<128x128xf32>
    %cst = arith.constant dense<0.000000e+00> : vector<80x128xf32>
    %14 = tpu.matmul %12, %13, %cst {dimension_numbers = #tpu.dot_dimension_numbers<[1], [0], [0], [1], [0, 0, 1, 1], [], []>} : vector<80x128xf32>, vector<128x128xf32>, vector<80x128xf32> -> vector<80x128xf32>
    %15 = vector.extract_strided_slice %14 {offsets = [0, 0], sizes = [16, 128], strides = [1, 1]} : vector<80x128xf32> to vector<16x128xf32>
    %c0_15 = arith.constant 0 : index
    %c0_16 = arith.constant 0 : index
    %16 = vector.load %arg7[%c0_15, %c0_16] : memref<16x640xf32, #tpu.memory_space<vmem>>, vector<16x128xf32>
    tpu.vector_store %arg7[%c0_15, %c0_16], %15 {strides = array<i32>} : memref<16x640xf32, #tpu.memory_space<vmem>>, vector<16x128xf32>,
    %17 = vector.extract_strided_slice %14 {offsets = [16, 0], sizes = [16, 128], strides = [1, 1]} : vector<80x128xf32> to vector<16x128xf32>
    %c0_17 = arith.constant 0 : index
    %c128 = arith.constant 128 : index
    %18 = vector.load %arg7[%c0_17, %c128] : memref<16x640xf32, #tpu.memory_space<vmem>>, vector<16x128xf32>
    tpu.vector_store %arg7[%c0_17, %c128], %17 {strides = array<i32>} : memref<16x640xf32, #tpu.memory_space<vmem>>, vector<16x128xf32>,
    %19 = vector.extract_strided_slice %14 {offsets = [32, 0], sizes = [16, 128], strides = [1, 1]} : vector<80x128xf32> to vector<16x128xf32>
    %c0_18 = arith.constant 0 : index
    %c256 = arith.constant 256 : index
    %20 = vector.load %arg7[%c0_18, %c256] : memref<16x640xf32, #tpu.memory_space<vmem>>, vector<16x128xf32>
    tpu.vector_store %arg7[%c0_18, %c256], %19 {strides = array<i32>} : memref<16x640xf32, #tpu.memory_space<vmem>>, vector<16x128xf32>,
    %21 = vector.extract_strided_slice %14 {offsets = [48, 0], sizes = [16, 128], strides = [1, 1]} : vector<80x128xf32> to vector<16x128xf32>
    %c0_19 = arith.constant 0 : index
    %c384 = arith.constant 384 : index
    %22 = vector.load %arg7[%c0_19, %c384] : memref<16x640xf32, #tpu.memory_space<vmem>>, vector<16x128xf32>
    tpu.vector_store %arg7[%c0_19, %c384], %21 {strides = array<i32>} : memref<16x640xf32, #tpu.memory_space<vmem>>, vector<16x128xf32>,
    %23 = vector.extract_strided_slice %14 {offsets = [64, 0], sizes = [16, 128], strides = [1, 1]} : vector<80x128xf32> to vector<16x128xf32>
    %c0_20 = arith.constant 0 : index
    %c512 = arith.constant 512 : index
    %24 = vector.load %arg7[%c0_20, %c512] : memref<16x640xf32, #tpu.memory_space<vmem>>, vector<16x128xf32>
    tpu.vector_store %arg7[%c0_20, %c512], %23 {strides = array<i32>} : memref<16x640xf32, #tpu.memory_space<vmem>>, vector<16x128xf32>,
    %c0_21 = arith.constant 0 : index
    %c0_22 = arith.constant 0 : index
    %25 = vector.load %arg4[%c0_21, %c0_22] : memref<16x16xf32, #tpu.memory_space<vmem>>, vector<16x16xf32>
    %c0_23 = arith.constant 0 : index
    %c0_24 = arith.constant 0 : index
    %26 = vector.load %arg7[%c0_23, %c0_24] : memref<16x640xf32, #tpu.memory_space<vmem>>, vector<16x640xf32>
    %cst_25 = arith.constant dense<0.000000e+00> : vector<16x640xf32>
    %27 = tpu.matmul %25, %26, %cst_25 {dimension_numbers = #tpu.dot_dimension_numbers<[1], [0], [0], [1], [0, 0, 1, 1], [], []>} : vector<16x16xf32>, vector<16x640xf32>, vector<16x640xf32> -> vector<16x640xf32>
    %28 = vector.extract_strided_slice %27 {offsets = [0, 0], sizes = [16, 128], strides = [1, 1]} : vector<16x640xf32> to vector<16x128xf32>
    %29 = vector.extract_strided_slice %27 {offsets = [0, 128], sizes = [16, 128], strides = [1, 1]} : vector<16x640xf32> to vector<16x128xf32>
    %30 = vector.extract_strided_slice %27 {offsets = [0, 256], sizes = [16, 128], strides = [1, 1]} : vector<16x640xf32> to vector<16x128xf32>
    %31 = vector.extract_strided_slice %27 {offsets = [0, 384], sizes = [16, 128], strides = [1, 1]} : vector<16x640xf32> to vector<16x128xf32>
    %32 = vector.extract_strided_slice %27 {offsets = [0, 512], sizes = [16, 128], strides = [1, 1]} : vector<16x640xf32> to vector<16x128xf32>
    %33 = arith.mulf %28, %28 : vector<16x128xf32>
    %34 = arith.mulf %29, %29 : vector<16x128xf32>
    %35 = arith.mulf %28, %29 : vector<16x128xf32>
    %36 = arith.subf %30, %33 : vector<16x128xf32>
    %37 = arith.subf %31, %34 : vector<16x128xf32>
    %38 = arith.subf %32, %35 : vector<16x128xf32>
    %cst_26 = arith.constant 2.000000e+00 : f32
    %39 = vector.broadcast %cst_26 : f32 to vector<16x128xf32>
    %40 = arith.mulf %39, %35 : vector<16x128xf32>
    %cst_27 = arith.constant 9.99999974E-5 : f32
    %41 = vector.broadcast %cst_27 : f32 to vector<16x128xf32>
    %42 = arith.addf %40, %41 : vector<16x128xf32>
    %cst_28 = arith.constant 2.000000e+00 : f32
    %43 = vector.broadcast %cst_28 : f32 to vector<16x128xf32>
    %44 = arith.mulf %43, %38 : vector<16x128xf32>
    %cst_29 = arith.constant 8.99999984E-4 : f32
    %45 = vector.broadcast %cst_29 : f32 to vector<16x128xf32>
    %46 = arith.addf %44, %45 : vector<16x128xf32>
    %47 = arith.mulf %42, %46 : vector<16x128xf32>
    %48 = arith.addf %33, %34 : vector<16x128xf32>
    %cst_30 = arith.constant 9.99999974E-5 : f32
    %49 = vector.broadcast %cst_30 : f32 to vector<16x128xf32>
    %50 = arith.addf %48, %49 : vector<16x128xf32>
    %51 = arith.addf %36, %37 : vector<16x128xf32>
    %cst_31 = arith.constant 8.99999984E-4 : f32
    %52 = vector.broadcast %cst_31 : f32 to vector<16x128xf32>
    %53 = arith.addf %51, %52 : vector<16x128xf32>
    %54 = arith.mulf %50, %53 : vector<16x128xf32>
    %55 = arith.divf %47, %54 : vector<16x128xf32>
    %56 = vector.shape_cast %55 : vector<16x128xf32> to vector<1x16x128xf32>
    %cst_32 = arith.constant dense<0.000000e+00> : vector<1xf32>
    %57 = vector.multi_reduction <add>, %56, %cst_32 [1, 2] : vector<1x16x128xf32> to vector<1xf32>
    %58 = vector.shape_cast %57 : vector<1xf32> to vector<1x1x1xf32>
    %59 = vector.extract %58[0, 0, 0] : f32 from vector<1x1x1xf32>
    %60 = vector.broadcast %59 : f32 to vector<1x1x128xf32>
    %c0_33 = arith.constant 0 : index
    %c0_34 = arith.constant 0 : index
    %c0_35 = arith.constant 0 : index
    %61 = vector.load %arg5[%c0_33, %c0_34, %c0_35] : memref<1x1x128xf32, #tpu.memory_space<vmem>>, vector<1x1x128xf32>
    tpu.vector_store %arg5[%c0_33, %c0_34, %c0_35], %60 {strides = array<i32>} : memref<1x1x128xf32, #tpu.memory_space<vmem>>, vector<1x1x128xf32>,
    return
  }
  func.func @transform_0(%arg0: i32) -> (i32, i32, i32) {
    %c0_i32 = arith.constant 0 : i32
    %c0_i32_0 = arith.constant 0 : i32
    %c0_i32_1 = arith.constant 0 : i32
    return %arg0, %c0_i32, %c0_i32_0 : i32, i32, i32
  }
  func.func @transform_1(%arg0: i32) -> (i32, i32, i32) {
    %c0_i32 = arith.constant 0 : i32
    %c0_i32_0 = arith.constant 0 : i32
    %c0_i32_1 = arith.constant 0 : i32
    return %arg0, %c0_i32, %c0_i32_0 : i32, i32, i32
  }
  func.func @transform_2(%arg0: i32) -> (i32, i32) {
    %c0_i32 = arith.constant 0 : i32
    %c0_i32_0 = arith.constant 0 : i32
    %c0_i32_1 = arith.constant 0 : i32
    return %c0_i32, %c0_i32_0 : i32, i32
  }
  func.func @transform_3(%arg0: i32) -> (i32, i32) {
    %c0_i32 = arith.constant 0 : i32
    %c0_i32_0 = arith.constant 0 : i32
    %c0_i32_1 = arith.constant 0 : i32
    return %c0_i32, %c0_i32_0 : i32, i32
  }
  func.func @transform_4(%arg0: i32) -> (i32, i32, i32) {
    %c0_i32 = arith.constant 0 : i32
    %c0_i32_0 = arith.constant 0 : i32
    %c0_i32_1 = arith.constant 0 : i32
    return %arg0, %c0_i32, %c0_i32_0 : i32, i32, i32
  }
}

</mosaic_0001>

<bundles_post_ra>
// kernel: ssim_loss.1
= control target key start
LH: loop header
LB: loop body
LE: loop exit
PB: predicated region body
PF: predicated region fallthrough
CT: control target
= control target key end

     0   :  { %vm132_vm0 = vcmask 130048   ;;  %s486_s2 = inlined_call_operand.vmem [shape: f32[128,128], index: 2, kind: input, shape index: {}]   ;;  %s487_s0 = inlined_call_operand.vmem [shape: f32[1,16,128], index: 0, kind: input, shape index: {}]   ;;  %s488_s1 = inlined_call_operand.vmem [shape: f32[1,16,128], index: 1, kind: input, shape index: {}]   ;;  %s489_s3 = inlined_call_operand.vmem [shape: f32[16,16], index: 3, kind: input, shape index: {}]   ;;  %s490_s4 = inlined_call_operand.vmem [shape: f32[1,1,128], index: 4, kind: output, shape index: {}]  }
   0x1   :  { %v62_v0 = vld [vmem:[%s486_s2 + $0x78] sm:$0xff]  ;;  %v61_v1 = vld [vmem:[%s486_s2 + $0x70] sm:$0xff]  ;;  %v60_v2 = vld [vmem:[%s486_s2 + $0x68] sm:$0xff] }
   0x2   :  { %63 = vmatpush.msra.mxu0 %v62_v0  ;;  %343 = vmatpush.msra.mxu3 %v62_v0  ;;  %v59_v3 = vld [vmem:[%s486_s2 + $0x60] sm:$0xff]  ;;  %v58_v4 = vld [vmem:[%s486_s2 + $0x58] sm:$0xff]  ;;  %v57_v5 = vld [vmem:[%s486_s2 + $0x50] sm:$0xff] }
   0x3   :  { %342 = vmatpush.msra.mxu2 %v62_v0  ;;  %v56_v6 = vld [vmem:[%s486_s2 + $0x48] sm:$0xff]  ;;  %v55_v7 = vld [vmem:[%s486_s2 + $0x40] sm:$0xff]  ;;  %v54_v8 = vld [vmem:[%s486_s2 + $0x38] sm:$0xff] }
   0x4   :  { %64 = vmatpush.msra.mxu0 %v61_v1  ;;  %345 = vmatpush.msra.mxu3 %v61_v1  ;;  %v53_v9 = vld [vmem:[%s486_s2 + $0x30] sm:$0xff]  ;;  %v52_v10 = vld [vmem:[%s486_s2 + $0x28] sm:$0xff]  ;;  %v51_v11 = vld [vmem:[%s486_s2 + $0x20] sm:$0xff] }
   0x5   :  { %344 = vmatpush.msra.mxu2 %v61_v1  ;;  %v50_v12 = vld [vmem:[%s486_s2 + $0x18] sm:$0xff]  ;;  %v49_v13 = vld [vmem:[%s486_s2 + $0x10] sm:$0xff]  ;;  %v18_v14 = vld [vmem:[%s487_s0 + $0x8] sm:$0xff] }
   0x6   :  { %65 = vmatpush.msra.mxu0 %v60_v2  ;;  %347 = vmatpush.msra.mxu3 %v60_v2  ;;  %v48_v15 = vld [vmem:[%s486_s2 + $0x8] sm:$0xff]  ;;  %v47_v16 = vld [vmem:[%s486_s2] sm:$0xff]  ;;  %v26_v17 = vmul.f32 %v18_v14, %v18_v14 }
   0x7   :  { %346 = vmatpush.msra.mxu2 %v60_v2  ;;  %v17_v18 = vld [vmem:[%s487_s0] sm:$0xff]  ;;  %v20_v22 = vld [vmem:[%s488_s1 + $0x8] sm:$0xff] }
   0x8   :  { %66 = vmatpush.msra.mxu0 %v59_v3  ;;  %349 = vmatpush.msra.mxu3 %v59_v3  ;;  %v25_v19 = vmul.f32 %v17_v18, %v17_v18  ;;  %v19_v20 = vld [vmem:[%s488_s1] sm:$0xff]  ;;  %v30_v23 = vmul.f32 %v20_v22, %v20_v22  ;;  %v34_v25 = vmul.f32 %v20_v22, %v18_v14  ;;  %v121_v32 = vld [vmem:[%s489_s3 + $0x8] sm:$0xff] }
   0x9   :  { %348 = vmatpush.msra.mxu2 %v59_v3  ;;  %v29_v21 = vmul.f32 %v19_v20, %v19_v20  ;;  %v33_v24 = vmul.f32 %v19_v20, %v17_v18  ;;  %v120_v29 = vld [vmem:[%s489_s3] sm:$0xff] }
   0xa   :  { %67 = vmatpush.msra.mxu0 %v58_v4  ;;  %351 = vmatpush.msra.mxu3 %v58_v4 }
   0xb   :  { %350 = vmatpush.msra.mxu2 %v58_v4 }
   0xc   :  { %68 = vmatpush.msra.mxu0 %v57_v5  ;;  %353 = vmatpush.msra.mxu3 %v57_v5 }
   0xd   :  { %352 = vmatpush.msra.mxu2 %v57_v5 }
   0xe   :  { %69 = vmatpush.msra.mxu0 %v56_v6  ;;  %355 = vmatpush.msra.mxu3 %v56_v6 }
   0xf   :  { %354 = vmatpush.msra.mxu2 %v56_v6 }
  0x10   :  { %70 = vmatpush.msra.mxu0 %v55_v7  ;;  %357 = vmatpush.msra.mxu3 %v55_v7 }
  0x11   :  { %356 = vmatpush.msra.mxu2 %v55_v7 }
  0x12   :  { %71 = vmatpush.msra.mxu0 %v54_v8  ;;  %359 = vmatpush.msra.mxu3 %v54_v8 }
  0x13   :  { %358 = vmatpush.msra.mxu2 %v54_v8 }
  0x14   :  { %72 = vmatpush.msra.mxu0 %v53_v9  ;;  %361 = vmatpush.msra.mxu3 %v53_v9 }
  0x15   :  { %360 = vmatpush.msra.mxu2 %v53_v9 }
  0x16   :  { %73 = vmatpush.msra.mxu0 %v52_v10  ;;  %363 = vmatpush.msra.mxu3 %v52_v10 }
  0x17   :  { %362 = vmatpush.msra.mxu2 %v52_v10 }
  0x18   :  { %74 = vmatpush.msra.mxu0 %v51_v11  ;;  %365 = vmatpush.msra.mxu3 %v51_v11 }
  0x19   :  { %364 = vmatpush.msra.mxu2 %v51_v11 }
  0x1a   :  { %75 = vmatpush.msra.mxu0 %v50_v12  ;;  %367 = vmatpush.msra.mxu3 %v50_v12 }
  0x1b   :  { %366 = vmatpush.msra.mxu2 %v50_v12 }
  0x1c   :  { %76 = vmatpush.msra.mxu0 %v49_v13  ;;  %369 = vmatpush.msra.mxu3 %v49_v13 }
  0x1d   :  { %368 = vmatpush.msra.mxu2 %v49_v13 }
  0x1e   :  { %77 = vmatpush.msra.mxu0 %v48_v15  ;;  %371 = vmatpush.msra.mxu3 %v48_v15 }
  0x1f   :  { %370 = vmatpush.msra.mxu2 %v48_v15 }
  0x20   :  { %78 = vmatpush.msra.mxu0 %v47_v16  ;;  %373 = vmatpush.msra.mxu3 %v47_v16 }
  0x21   :  { %79 = vmatmul.f32.vlgmr.msra.gmra.mxu0 %v17_v18  ;;  %94 = vmatmul.f32.vlgmr.msra.gmra.mxu3 %v26_v17 }
  0x22   :  { %372 = vmatpush.msra.mxu2 %v47_v16 }
  0x23   :  { %91 = vmatmul.f32.vlgmr.msra.gmra.mxu2 %v25_v19 }
  0x29   :  { %82 = vmatmul.f32.gmra.mxu0 %v18_v14  ;;  %97 = vmatmul.f32.gmra.mxu3 %v29_v21 }
  0x31   :  { %85 = vmatmul.f32.gmra.mxu0 %v19_v20  ;;  %100 = vmatmul.f32.gmra.mxu3 %v30_v23 }
  0x39   :  { %88 = vmatmul.f32.gmra.mxu0 %v20_v22  ;;  %103 = vmatmul.f32.gmra.mxu3 %v33_v24 }
  0x41   :  { %106 = vmatmul.f32.gmra.mxu3 %v34_v25 }
  0x9e   :  { %v80_v26 = vpop.f32.mrf.mxu0 }
  0xa4   :  { %v95_v27 = vpop.f32.mrf.mxu3 }
  0xa6   :  { %v83_v28 = vpop.f32.mrf.mxu0  ;;  %v92_v35 = vpop.f32.mrf.mxu2 }
  0xa7   :  { %153 = vmatpush.msra.mxu1 %v83_v28 }
  0xa9   :  { %154 = vmatpush.msra.mxu1 %v80_v26 }
  0xaa   :  { %332 = vmatmul.msk.f32.vlgmr.msra.gmra.mxu1 %vm132_vm0, %v120_v29 }
  0xac   :  { %v98_v30 = vpop.f32.mrf.mxu3 }
  0xae   :  { %v86_v31 = vpop.f32.mrf.mxu0 }
  0xb2   :  { %333 = vmatmul.msk.f32.gmra.mxu1 %vm132_vm0, %v121_v32 }
  0xb4   :  { %v101_v33 = vpop.f32.mrf.mxu3 }
  0xb6   :  { %v89_v34 = vpop.f32.mrf.mxu0 }
  0xb7   :  { %176 = vmatpush.msrb.mxu1 %v89_v34  ;;  %374 = vmatpush.msrb.mxu2 %v89_v34 }
  0xb9   :  { %177 = vmatpush.msrb.mxu1 %v86_v31  ;;  %375 = vmatpush.msrb.mxu2 %v86_v31 }
  0xba   :  { %334 = vmatmul.msk.f32.vlgmr.msrb.gmra.mxu1 %vm132_vm0, %v120_v29  ;;  %335 = vmatmul.msk.f32.vlgmr.msrb.gmra.mxu2 %vm132_vm0, %v121_v32 }
  0xbb   :  { %199 = vmatpush.msra.mxu1 %v95_v27 }
  0xbc   :  { %v104_v36 = vpop.f32.mrf.mxu3 }
  0xbd   :  { %200 = vmatpush.msra.mxu1 %v92_v35 }
  0xbf   :  { %222 = vmatpush.msrb.mxu1 %v101_v33 }
  0xc1   :  { %223 = vmatpush.msrb.mxu1 %v98_v30 }
  0xc2   :  { %336 = vmatmul.msk.f32.vlgmr.msra.gmra.mxu1 %vm132_vm0, %v120_v29 }
  0xc4   :  { %v107_v37 = vpop.f32.mrf.mxu3 }
  0xc5   :  { %245 = vmatpush.msra.mxu2 %v107_v37 }
  0xc7   :  { %246 = vmatpush.msra.mxu2 %v104_v36 }
  0xc8   :  { %340 = vmatmul.msk.f32.vlgmr.msra.gmra.mxu2 %vm132_vm0, %v120_v29 }
  0xca   :  { %337 = vmatmul.msk.f32.gmra.mxu1 %vm132_vm0, %v121_v32 }
  0xd0   :  { %341 = vmatmul.msk.f32.gmra.mxu2 %vm132_vm0, %v121_v32 }
  0xd2   :  { %338 = vmatmul.msk.f32.vlgmr.msrb.gmra.mxu1 %vm132_vm0, %v120_v29 }
  0xda   :  { %339 = vmatmul.msk.f32.gmra.mxu1 %vm132_vm0, %v121_v32 }
 0x127   :  { %v156_v38 = vpop.f32.mrf.mxu1 }
 0x128   :  { %v254_v45 = vmul.f32 %v156_v38, %v156_v38 }
 0x12f   :  { %v159_v39 = vpop.f32.mrf.mxu1 }
 0x130   :  { %v255_v55 = vmul.f32 %v159_v39, %v159_v39 }
 0x137   :  { %v179_v40 = vpop.f32.mrf.mxu1 }
 0x138   :  { %v256_v43 = vmul.f32 %v179_v40, %v179_v40  ;;  %v258_v4 = vmul.f32 %v179_v40, %v156_v38 }
 0x13a   :  { %v276_v47 = vadd.f32 %v256_v43, %v254_v45  ;;  %v266_v15 = vmul.f32 2.0, %v258_v4 }
 0x13c   :  { %v278_v51 = vadd.f32 0.0001, %v276_v47  ;;  %v268_v26 = vadd.f32 0.0001, %v266_v15 }
 0x13d   :  { %v182_v44 = vpop.f32.mrf.mxu2 }
 0x13e   :  { %v257_v52 = vmul.f32 %v182_v44, %v182_v44  ;;  %v259_v5 = vmul.f32 %v182_v44, %v159_v39 }
 0x13f   :  { %v202_v41 = vpop.f32.mrf.mxu1 }
 0x140   :  { %v260_v48 = vsub.f32 %v202_v41, %v254_v45  ;;  %v277_v58 = vadd.f32 %v257_v52, %v255_v55  ;;  %v267_v17 = vmul.f32 2.0, %v259_v5 }
 0x142   :  { %v279_v62 = vadd.f32 0.0001, %v277_v58  ;;  %v269_v28 = vadd.f32 0.0001, %v267_v17 }
 0x147   :  { %v205_v42 = vpop.f32.mrf.mxu1 }
 0x148   :  { %v261_v59 = vsub.f32 %v205_v42, %v255_v55 }
 0x14b   :  { %v248_v54 = vpop.f32.mrf.mxu2 }
 0x14c   :  { %v264_v7 = vsub.f32 %v248_v54, %v258_v4 }
 0x14e   :  { %v270_v11 = vmul.f32 2.0, %v264_v7 }
 0x14f   :  { %v225_v46 = vpop.f32.mrf.mxu1 }
 0x150   :  { %v262_v49 = vsub.f32 %v225_v46, %v256_v43  ;;  %v272_v20 = vadd.f32 0.0009, %v270_v11 }
 0x152   :  { %v280_v50 = vadd.f32 %v262_v49, %v260_v48  ;;  %v274_v32 = vmul.f32 %v272_v20, %v268_v26 }
 0x153   :  { %v251_v2 = vpop.f32.mrf.mxu2 }
 0x154   :  { %v282_v53 = vadd.f32 0.0009, %v280_v50  ;;  %v265_v8 = vsub.f32 %v251_v2, %v259_v5 }
 0x156   :  { %v284_v56 = vmul.f32 %v282_v53, %v278_v51  ;;  %v271_v12 = vmul.f32 2.0, %v265_v8 }
 0x157   :  { %v228_v57 = vpop.f32.mrf.mxu1 }
 0x158   :  { %378 = vrcp.f32 %v284_v56  ;;  %v263_v60 = vsub.f32 %v228_v57, %v257_v52  ;;  %v297_v16 = vand.u32 2147483648, %v284_v56  ;;  %vm291_vm2 = vweird.f32 %v284_v56 }
 0x159   :  { %v295_v18 = vand.u32 2147483647, %v284_v56  ;;  %v273_v21 = vadd.f32 0.0009, %v271_v12 }
 0x15a   :  { %v281_v61 = vadd.f32 %v263_v60, %v261_v59  ;;  %v298_v27 = vor.u32 1.1754944e-38, %v297_v16 }
 0x15b   :  { %vm296_vm5 = vcmp.eq.f32.partialorder %v295_v18, 8.507059e+37  ;;  %v275_v33 = vmul.f32 %v273_v21, %v269_v28 }
 0x15c   :  { %v283_v63 = vadd.f32 0.0009, %v281_v61 }
 0x15e   :  { %v379_v0 = vpop.eup %378  ;;  %v285_v1 = vmul.f32 %v283_v63, %v279_v62 }
 0x15f   :  { %v287_v3 = vmul.f32 %v379_v0, %v284_v56  ;;  %vm292_vm1 = vweird.f32 %v379_v0 }
 0x160   :  { %380 = vrcp.f32 %v285_v1  ;;  %vm293_vm3 = vmor %vm291_vm2, %vm292_vm1  ;;  %v312_v22 = vand.u32 2147483648, %v285_v1  ;;  %v310_v25 = vand.u32 2147483647, %v285_v1  ;;  %vm306_vm6 = vweird.f32 %v285_v1 }
 0x161   :  { %v288_v6 = vsub.f32 1.0, %v287_v3 }
 0x162   :  { %v313_v31 = vor.u32 1.1754944e-38, %v312_v22  ;;  %vm311_vm8 = vcmp.eq.f32.partialorder %v310_v25, 8.507059e+37 }
 0x163   :  { %v289_v9 = vmul.f32 %v379_v0, %v288_v6 }
 0x165   :  { %v290_v13 = vadd.f32 %v379_v0, %v289_v9 }
 0x166   :  { %v381_v10 = vpop.eup %380 }
 0x167   :  { %v302_v14 = vmul.f32 %v381_v10, %v285_v1  ;;  %v294_v23 = vsel %vm293_vm3, %v379_v0, %v290_v13  ;;  %vm307_vm4 = vweird.f32 %v381_v10 }
 0x168   :  { %v299_v30 = vsel %vm296_vm5, %v298_v27, %v294_v23  ;;  %vm308_vm7 = vmor %vm306_vm6, %vm307_vm4 }
 0x169   :  { %v303_v19 = vsub.f32 1.0, %v302_v14  ;;  %v300_v36 = vmul.f32 %v299_v30, %v274_v32 }
 0x16b   :  { %v304_v24 = vmul.f32 %v381_v10, %v303_v19 }
 0x16d   :  { %v305_v29 = vadd.f32 %v381_v10, %v304_v24 }
 0x16f   :  { %v309_v34 = vsel %vm308_vm7, %v381_v10, %v305_v29 }
 0x170   :  { %v314_v35 = vsel %vm311_vm8, %v313_v31, %v309_v34 }
 0x171   :  { %v315_v37 = vmul.f32 %v314_v35, %v275_v33 }
 0x173   :  { %v316_v38 = vadd.f32 %v315_v37, %v300_v36 }
 0x175   :  { %317 = vadd.xlane.f32.xlu0 %v316_v38 }
 0x1e8   :  { %v318_v39 = vpop.xlane.xlu0 %317 }
 0x1e9   :  { %v319_v40 = vrot.slane %v318_v39, 4 }
 0x1eb   :  { %v320_v41 = vadd.f32 %v319_v40, %v318_v39 }
 0x1ed   :  { %v321_v42 = vrot.slane %v320_v41, 2 }
 0x1ef   :  { %v322_v43 = vadd.f32 %v321_v42, %v320_v41 }
 0x1f1   :  { %v323_v44 = vrot.slane %v322_v43, 1 }
 0x1f3   :  { %v324_v45 = vadd.f32 %v323_v44, %v322_v43 }
 0x1f5   :  { %376 = vpush %v324_v45 }
 0x226   :  { %s377_s3 = spop %376 }
 0x227   :  { %v326_v46 = vstv %s377_s3 }
 0x228   :  { %327 = vst [vmem:[%s490_s4] sm:$0x1] %v326_v46 }

</bundles_post_ra>
